<compile_context>
chip_gen: v5e
topology: v5e:2x2
jax: 0.10.0
libtpu: 0.0.40
codegen_flags: <defaults>
</compile_context>

<pallas_src>
import functools

import jax
import jax.numpy as jnp
from jax import lax
from jax.experimental import pallas as pl
from jax.experimental.pallas import tpu as pltpu


def _round_up(x, m):
    return ((x + m - 1) // m) * m


def _cdiv(a, b):
    return -(-a // b)


# ----------------------------- Pallas kernel ---------------------------------

def _gconv_kernel(xa_ref, xh_ref, w_ref, b_ref, o_ref, *, offsets, tq, c_pad, gated):
    """One pixel tile of the fused direct conv (+ optional ELU/sigmoid gating).

    xa_ref: (Cin_p, TQ)    bf16/f32  flattened padded input, this tile's window
    xh_ref: (Cin_p, HALO)  bf16/f32  right halo (start of the next tile's window)
    w_ref : (Cconv_p, K)   bf16/f32  fused conv weight, K = k*k*Cin_p (tap-major), resident
    b_ref : (Cconv_p, 1)   f32       fused bias, resident
    o_ref : (C_p, TQ)      f32       output (lane-dense store)
    """
    xcat = jnp.concatenate([xa_ref[...], xh_ref[...]], axis=1)      # (Cin_p, TQ + HALO)
    # Build the (K, TQ) patch block from k*k lane-shifted windows.  Offsets are static
    # Python ints -> cheap in-VMEM shifts (XLU/VPU), no extra HBM traffic.
    patch = jnp.concatenate([xcat[:, off:off + tq] for off in offsets], axis=0)
    z = jnp.dot(w_ref[...], patch, preferred_element_type=jnp.float32)
    z = z + b_ref[...]
    if gated:
        a = z[:c_pad, :]            # feature half (sublane-aligned split: c_pad % 8 == 0)
        g = z[c_pad:, :]            # gate half
        # ELU (alpha = 1).  exp(a)-1 kept over expm1 for guaranteed Mosaic lowering.
        feat = jnp.where(a > 0.0, a, jnp.exp(a) - 1.0)
        gate = 1.0 / (1.0 + jnp.exp(-g))            # exact sigmoid (EUP exp + divide)
        # TODO(synk): on v6e/v7x this tail could run in bf16 (2x VPU/EUP packing); kept
        # f32 so the same kernel is exact and optimal on v5e as well.
        o_ref[...] = (feat * gate).astype(o_ref.dtype)
    else:
        o_ref[...] = z.astype(o_ref.dtype)


def _gconv_pallas(xflat, w_cat, b_cat, *, offsets, tq, halo, n_tiles, c_pad, gated):
    """xflat: (N, Cin_p, L); w_cat: (Cconv_p, K); b_cat: (Cconv_p, 1) -> (N, C_p, n_tiles*tq)."""
    n, cin_p, _ = xflat.shape
    cconv, k_dim = w_cat.shape
    ratio = tq // halo
    kern = functools.partial(_gconv_kernel, offsets=tuple(offsets), tq=tq,
                             c_pad=c_pad, gated=gated)
    return pl.pallas_call(
        kern,
        out_shape=jax.ShapeDtypeStruct((n, c_pad, n_tiles * tq), jnp.float32),
        grid_spec=pltpu.PrefetchScalarGridSpec(
            num_scalar_prefetch=0,
            grid=(n, n_tiles),
            in_specs=[
                # main pixel-tile window of the flattened input (streamed, double-buffered)
                pl.BlockSpec((None, cin_p, tq), lambda i, j: (i, 0, j)),
                # 128-aligned right halo = start of the next tile's window
                pl.BlockSpec((None, cin_p, halo), lambda i, j: (i, 0, (j + 1) * ratio)),
                pl.BlockSpec((cconv, k_dim), lambda i, j: (0, 0)),   # resident weight
                pl.BlockSpec((cconv, 1), lambda i, j: (0, 0)),       # resident bias
            ],
            out_specs=pl.BlockSpec((None, c_pad, tq), lambda i, j: (i, 0, j)),
        ),
        compiler_params=pltpu.CompilerParams(
            dimension_semantics=("parallel", "parallel"),
            vmem_limit_bytes=32 * 1024 * 1024),
    )(xflat, xflat, w_cat, b_cat)


# ------------------------------ tile sizing -----------------------------------

def _vmem_budget_bytes():
    """Per-generation VMEM budget for the per-tile working set (conservative)."""
    budget = 12 * 1024 * 1024
    try:
        cap = int(pltpu.get_tpu_info().vmem_capacity_bytes)
        # v5e/v6e: 128 MiB -> 16 MiB budget; v7x: 64 MiB -> 8 MiB budget.
        budget = min(max(cap // 8, 8 * 1024 * 1024), 16 * 1024 * 1024)
    except Exception:
        pass
    return budget


def _pick_pixel_tile(q, halo, bytes_per_col, max_tile):
    """Pick the pixel-tile length: VMEM-budgeted, multiple of `halo`, small last-tile waste."""
    cols = max(_vmem_budget_bytes() // max(bytes_per_col, 1), 1)
    cap = max(halo, (min(cols, max_tile) // halo) * halo)
    n_tiles = _cdiv(q, cap)
    tq = _round_up(_cdiv(q, n_tiles), halo)       # balance tiles; waste < halo overall
    n_tiles = _cdiv(q, tq)
    return tq, n_tiles


# ------------------------------ GConv wrapper ----------------------------------

def gconv_forward(x, w, b, cnum_out, ksize, stride=1, rate=1, activation="elu",
                  compute_dtype=jnp.bfloat16, max_pixel_tile=4096):
    """x: (N, Cin, H, W) f32; w: (num_conv_out, Cin, k, k); b: (num_conv_out,).

    Matches GConv.forward: SAME pad -> conv -> (split, ELU, sigmoid, multiply) on the
    gated path, plain conv output otherwise.  Returns f32 NCHW.
    """
    n, cin, h, w_in = x.shape
    gated = not (cnum_out == 3 or activation is None)
    num_conv_out = w.shape[0]

    # --- TF 'SAME' padding (stride-aware; identical formula to the PyTorch reference) ---
    fh = (ksize - 1) * rate + 1
    out_h = _cdiv(h, stride)
    out_w = _cdiv(w_in, stride)
    pad_h = max((out_h - 1) * stride + fh - h, 0)
    pad_w = max((out_w - 1) * stride + fh - w_in, 0)
    pt, pb = pad_h // 2, pad_h - pad_h // 2
    pleft, pright = pad_w // 2, pad_w - pad_w // 2
    hp, wp = h + pad_h, w_in + pad_w

    # stride-1 VALID conv on the padded input; stride>1 falls out of the subsample below.
    oh1, ow1 = hp - fh + 1, wp - fh + 1
    q = oh1 * wp                                   # flattened "wrapped raster" length
    maxoff = (fh - 1) * (wp + 1)                   # largest tap offset
    halo = _round_up(max(maxoff, 1), 128)

    cin_p = _round_up(cin, 8)                      # sublane-aligned channel axes
    c_pad = _round_up(cnum_out if gated else num_conv_out, 8)
    k_dim = ksize * ksize * cin_p

    itemsize = 2 if compute_dtype == jnp.bfloat16 else 4
    bytes_per_col = (cin_p * (3 + ksize * ksize) * itemsize    # input dbuf + xcat + patch
                     + c_pad * (8 + 16))                       # output dbuf + z / tail temps
    tq, n_tiles = _pick_pixel_tile(q, halo, bytes_per_col, max_pixel_tile)

    # --- input: cast, pad (channels + SAME + extra wrap rows) and flatten -- one pass ---
    if compute_dtype is not None:
        x = x.astype(compute_dtype)
    lneed = n_tiles * tq + halo
    extra_rows = _cdiv(max(lneed - hp * wp, 0), wp)
    xp = jnp.pad(x, ((0, 0), (0, cin_p - cin), (pt, pb + extra_rows), (pleft, pright)))
    xflat = xp.reshape(n, cin_p, (hp + extra_rows) * wp)

    # --- weight / bias: tap-major (kh, kw, cin) columns, channel-padded rows ---
    w_t = jnp.transpose(w, (0, 2, 3, 1))                        # (Cconv, k, k, Cin)
    if cin_p != cin:
        w_t = jnp.pad(w_t, ((0, 0), (0, 0), (0, 0), (0, cin_p - cin)))
    w_flat = w_t.reshape(num_conv_out, k_dim)
    b_f32 = b.astype(jnp.float32)
    if gated:
        w_cat = jnp.zeros((2 * c_pad, k_dim), w_flat.dtype)
        w_cat = w_cat.at[:cnum_out].set(w_flat[:cnum_out])
        w_cat = w_cat.at[c_pad:c_pad + cnum_out].set(w_flat[cnum_out:])
        b_cat = jnp.zeros((2 * c_pad, 1), jnp.float32)
        b_cat = b_cat.at[:cnum_out, 0].set(b_f32[:cnum_out])
        b_cat = b_cat.at[c_pad:c_pad + cnum_out, 0].set(b_f32[cnum_out:])
    else:
        w_cat = jnp.zeros((c_pad, k_dim), w_flat.dtype)
        w_cat = w_cat.at[:num_conv_out].set(w_flat)
        b_cat = jnp.zeros((c_pad, 1), jnp.float32)
        b_cat = b_cat.at[:num_conv_out, 0].set(b_f32)
    if compute_dtype is not None:
        w_cat = w_cat.astype(compute_dtype)

    offsets = tuple((kh * rate) * wp + kw * rate
                    for kh in range(ksize) for kw in range(ksize))

    out_flat = _gconv_pallas(xflat, w_cat, b_cat, offsets=offsets, tq=tq, halo=halo,
                             n_tiles=n_tiles, c_pad=c_pad, gated=gated)

    # --- unwrap: drop padded channels / wrap columns, apply stride by subsampling ---
    c_keep = cnum_out if gated else num_conv_out
    out = out_flat[:, :c_keep, :q].reshape(n, c_keep, oh1, wp)
    out = out[:, :, ::stride, :ow1]
    out = out[:, :, :, ::stride]
    return out


# ------------------------------ reference (plain JAX) --------------------------

def same_padding_nchw(x, ksizes, strides, rates):
    in_h, in_w = x.shape[2], x.shape[3]
    out_h = -(in_h // -strides[0])
    out_w = -(in_w // -strides[1])
    fh = (ksizes[0] - 1) * rates[0] + 1
    fw = (ksizes[1] - 1) * rates[1] + 1
    pad_h = max((out_h - 1) * strides[0] + fh - in_h, 0)
    pad_w = max((out_w - 1) * strides[1] + fw - in_w, 0)
    pt, pb = pad_h // 2, pad_h - pad_h // 2
    pl_, pr = pad_w // 2, pad_w - pad_w // 2
    return jnp.pad(x, ((0, 0), (0, 0), (pt, pb), (pl_, pr)))


def gconv_reference(x, w, b, cnum_out, ksize, stride=1, rate=1, cast_dtype=None):
    if cast_dtype is not None:
        x = x.astype(cast_dtype)
        w = w.astype(cast_dtype)
    xp = same_padding_nchw(x, [ksize, ksize], [stride, stride], [rate, rate])
    z = lax.conv_general_dilated(
        xp, w, window_strides=(stride, stride), padding="VALID",
        rhs_dilation=(rate, rate),
        dimension_numbers=("NCHW", "OIHW", "NCHW"),
        preferred_element_type=jnp.float32)
    z = z + b.reshape(1, -1, 1, 1).astype(jnp.float32)
    a, g = z[:, :cnum_out], z[:, cnum_out:]
    a = jnp.where(a > 0, a, jnp.exp(a) - 1.0)        # ELU
    g = 1.0 / (1.0 + jnp.exp(-g))                    # sigmoid
    return a * g


def init_gconv_params(key, cnum_in, cnum_out, ksize, activation_is_elu=True):
    """Param init mirroring GConv.__init__: kaiming_uniform (relu gain, fan_out), zero bias."""
    num_conv_out = cnum_out if (cnum_out == 3 or not activation_is_elu) else 2 * cnum_out
    fan_out = num_conv_out * ksize * ksize
    gain = 2.0 ** 0.5
    bound = gain * (3.0 / fan_out) ** 0.5
    w = jax.random.uniform(key, (num_conv_out, cnum_in, ksize, ksize),
                           minval=-bound, maxval=bound, dtype=jnp.float32)
    b = jnp.zeros((num_conv_out,), dtype=jnp.float32)
    return w, b


# ----------------------------------- main --------------------------------------

if __name__ == "__main__":
    key = jax.random.PRNGKey(0)
    k_x, k_w = jax.random.split(key)

    # Small shapes consistent with the module (gated path: cnum_out != 3, activation=ELU)
    N, CIN, H, W = 2, 4, 16, 16
    COUT, KSIZE, RATE = 8, 3, 1

    x = jax.random.normal(k_x, (N, CIN, H, W), dtype=jnp.float32)
    w, b = init_gconv_params(k_w, CIN, COUT, KSIZE)

    # ---- stride=1 gated path ----
    fwd = jax.jit(functools.partial(gconv_forward, cnum_out=COUT, ksize=KSIZE,
                                    stride=1, rate=RATE))
    out = jax.block_until_ready(fwd(x, w, b))
    assert out.shape == (N, COUT, H, W), out.shape

    # Tight check against a reference seeing the same bf16-rounded operands ...
    ref_bf16 = gconv_reference(x, w, b, COUT, KSIZE, 1, RATE, cast_dtype=jnp.bfloat16)
    err_bf16 = float(jnp.max(jnp.abs(out - ref_bf16)))
    assert jnp.allclose(out, ref_bf16, atol=3e-2, rtol=3e-2), err_bf16

    # ... and a looser check against the full-f32 PyTorch-equivalent reference.
    ref_f32 = gconv_reference(x, w, b, COUT, KSIZE, 1, RATE)
    err_f32 = float(jnp.max(jnp.abs(out - ref_f32)))
    assert jnp.allclose(out, ref_f32, atol=1e-1, rtol=1e-1), err_f32

    # ---- stride=2 downsampling path (same kernel; output subsampled in the wrapper) ----
    fwd_s2 = jax.jit(functools.partial(gconv_forward, cnum_out=COUT, ksize=KSIZE,
                                       stride=2, rate=RATE))
    out_s2 = jax.block_until_ready(fwd_s2(x, w, b))
    ref_s2 = gconv_reference(x, w, b, COUT, KSIZE, 2, RATE, cast_dtype=jnp.bfloat16)
    assert out_s2.shape == ref_s2.shape, (out_s2.shape, ref_s2.shape)
    err_s2 = float(jnp.max(jnp.abs(out_s2 - ref_s2)))
    assert jnp.allclose(out_s2, ref_s2, atol=3e-2, rtol=3e-2), err_s2

    print("KERNEL_OK")
</pallas_src>

<mosaic_0001>
module attributes {stable_mosaic.version = 11 : i64} {
  func.func @_gconv_kernel(%arg0: i32, %arg1: i32, %arg2: memref<1x8x384xbf16, #tpu.memory_space<vmem>>, %arg3: memref<1x8x128xbf16, #tpu.memory_space<vmem>>, %arg4: memref<16x72xbf16, #tpu.memory_space<vmem>>, %arg5: memref<16x1xf32, #tpu.memory_space<vmem>>, %arg6: memref<1x8x384xf32, #tpu.memory_space<vmem>>) attributes {dimension_semantics = [#tpu.dimension_semantics<parallel>, #tpu.dimension_semantics<parallel>], iteration_bounds = array<i64: 2, 1>, scalar_prefetch = 0 : i64, scratch_operands = 0 : i64, tpu.core_type = #tpu.core_type<tc>, window_params = [{transform_indices = @transform_0, window_bounds = array<i64: 1, 8, 384>}, {transform_indices = @transform_1, window_bounds = array<i64: 1, 8, 128>}, {pipeline_mode = #tpu.pipeline_mode<synchronous>, transform_indices = @transform_2, window_bounds = array<i64: 16, 72>}, {pipeline_mode = #tpu.pipeline_mode<synchronous>, transform_indices = @transform_3, window_bounds = array<i64: 16, 1>}, {transform_indices = @transform_4, window_bounds = array<i64: 1, 8, 384>}]} {
    %c0 = arith.constant 0 : index
    %c0_0 = arith.constant 0 : index
    %c0_1 = arith.constant 0 : index
    %0 = vector.load %arg2[%c0, %c0_0, %c0_1] : memref<1x8x384xbf16, #tpu.memory_space<vmem>>, vector<1x8x384xbf16>
    %1 = vector.shape_cast %0 : vector<1x8x384xbf16> to vector<8x384xbf16>
    %c0_2 = arith.constant 0 : index
    %c0_3 = arith.constant 0 : index
    %c0_4 = arith.constant 0 : index
    %2 = vector.load %arg3[%c0_2, %c0_3, %c0_4] : memref<1x8x128xbf16, #tpu.memory_space<vmem>>, vector<1x8x128xbf16>
    %3 = vector.shape_cast %2 : vector<1x8x128xbf16> to vector<8x128xbf16>
    %4 = tpu.concatenate %1, %3 in 1 : vector<8x384xbf16>, vector<8x128xbf16> -> vector<8x512xbf16>
    %5 = vector.extract_strided_slice %4 {offsets = [0, 0], sizes = [8, 384], strides = [1, 1]} : vector<8x512xbf16> to vector<8x384xbf16>
    %6 = vector.extract_strided_slice %4 {offsets = [0, 1], sizes = [8, 384], strides = [1, 1]} : vector<8x512xbf16> to vector<8x384xbf16>
    %7 = vector.extract_strided_slice %4 {offsets = [0, 2], sizes = [8, 384], strides = [1, 1]} : vector<8x512xbf16> to vector<8x384xbf16>
    %8 = vector.extract_strided_slice %4 {offsets = [0, 18], sizes = [8, 384], strides = [1, 1]} : vector<8x512xbf16> to vector<8x384xbf16>
    %9 = vector.extract_strided_slice %4 {offsets = [0, 19], sizes = [8, 384], strides = [1, 1]} : vector<8x512xbf16> to vector<8x384xbf16>
    %10 = vector.extract_strided_slice %4 {offsets = [0, 20], sizes = [8, 384], strides = [1, 1]} : vector<8x512xbf16> to vector<8x384xbf16>
    %11 = vector.extract_strided_slice %4 {offsets = [0, 36], sizes = [8, 384], strides = [1, 1]} : vector<8x512xbf16> to vector<8x384xbf16>
    %12 = vector.extract_strided_slice %4 {offsets = [0, 37], sizes = [8, 384], strides = [1, 1]} : vector<8x512xbf16> to vector<8x384xbf16>
    %13 = vector.extract_strided_slice %4 {offsets = [0, 38], sizes = [8, 384], strides = [1, 1]} : vector<8x512xbf16> to vector<8x384xbf16>
    %14 = tpu.concatenate %5, %6, %7, %8, %9, %10, %11, %12, %13 in 0 : vector<8x384xbf16>, vector<8x384xbf16>, vector<8x384xbf16>, vector<8x384xbf16>, vector<8x384xbf16>, vector<8x384xbf16>, vector<8x384xbf16>, vector<8x384xbf16>, vector<8x384xbf16> -> vector<72x384xbf16>
    %c0_5 = arith.constant 0 : index
    %c0_6 = arith.constant 0 : index
    %15 = vector.load %arg4[%c0_5, %c0_6] : memref<16x72xbf16, #tpu.memory_space<vmem>>, vector<16x72xbf16>
    %cst = arith.constant dense<0.000000e+00> : vector<16x384xf32>
    %16 = tpu.matmul %15, %14, %cst {dimension_numbers = #tpu.dot_dimension_numbers<[1], [0], [0], [1], [0, 0, 1, 1], [], []>} : vector<16x72xbf16>, vector<72x384xbf16>, vector<16x384xf32> -> vector<16x384xf32>
    %c0_7 = arith.constant 0 : index
    %c0_8 = arith.constant 0 : index
    %17 = vector.load %arg5[%c0_7, %c0_8] : memref<16x1xf32, #tpu.memory_space<vmem>>, vector<16x1xf32>
    %18 = vector.broadcast %17 : vector<16x1xf32> to vector<16x384xf32>
    %19 = arith.addf %16, %18 : vector<16x384xf32>
    %20 = vector.extract_strided_slice %19 {offsets = [0, 0], sizes = [8, 384], strides = [1, 1]} : vector<16x384xf32> to vector<8x384xf32>
    %21 = vector.extract_strided_slice %19 {offsets = [8, 0], sizes = [8, 384], strides = [1, 1]} : vector<16x384xf32> to vector<8x384xf32>
    %cst_9 = arith.constant 0.000000e+00 : f32
    %22 = vector.broadcast %cst_9 : f32 to vector<8x384xf32>
    %23 = arith.cmpf ogt, %20, %22 : vector<8x384xf32>
    %24 = math.exp %20 : vector<8x384xf32>
    %cst_10 = arith.constant 1.000000e+00 : f32
    %25 = vector.broadcast %cst_10 : f32 to vector<8x384xf32>
    %26 = arith.subf %24, %25 : vector<8x384xf32>
    %27 = arith.select %23, %20, %26 : vector<8x384xi1>, vector<8x384xf32>
    %cst_11 = arith.constant 0.000000e+00 : f32
    %28 = vector.broadcast %cst_11 : f32 to vector<8x384xf32>
    %29 = arith.subf %28, %21 : vector<8x384xf32>
    %30 = math.exp %29 : vector<8x384xf32>
    %cst_12 = arith.constant 1.000000e+00 : f32
    %31 = vector.broadcast %cst_12 : f32 to vector<8x384xf32>
    %32 = arith.addf %31, %30 : vector<8x384xf32>
    %cst_13 = arith.constant 1.000000e+00 : f32
    %33 = vector.broadcast %cst_13 : f32 to vector<8x384xf32>
    %34 = arith.divf %33, %32 : vector<8x384xf32>
    %35 = arith.mulf %27, %34 : vector<8x384xf32>
    %c0_14 = arith.constant 0 : index
    %c0_15 = arith.constant 0 : index
    %c0_16 = arith.constant 0 : index
    %36 = vector.load %arg6[%c0_14, %c0_15, %c0_16] : memref<1x8x384xf32, #tpu.memory_space<vmem>>, vector<1x8x384xf32>
    %37 = vector.shape_cast %36 : vector<1x8x384xf32> to vector<8x384xf32>
    %38 = vector.shape_cast %35 : vector<8x384xf32> to vector<1x8x384xf32>
    tpu.vector_store %arg6[%c0_14, %c0_15, %c0_16], %38 {strides = array<i32>} : memref<1x8x384xf32, #tpu.memory_space<vmem>>, vector<1x8x384xf32>,
    return
  }
  func.func @transform_0(%arg0: i32, %arg1: i32) -> (i32, i32, i32) {
    %c0_i32 = arith.constant 0 : i32
    %c0_i32_0 = arith.constant 0 : i32
    return %arg0, %c0_i32, %arg1 : i32, i32, i32
  }
  func.func @transform_1(%arg0: i32, %arg1: i32) -> (i32, i32, i32) {
    %c1_i32 = arith.constant 1 : i32
    %0 = arith.addi %arg1, %c1_i32 : i32
    %c3_i32 = arith.constant 3 : i32
    %1 = arith.muli %0, %c3_i32 : i32
    %c0_i32 = arith.constant 0 : i32
    %c0_i32_0 = arith.constant 0 : i32
    return %arg0, %c0_i32, %1 : i32, i32, i32
  }
  func.func @transform_2(%arg0: i32, %arg1: i32) -> (i32, i32) {
    %c0_i32 = arith.constant 0 : i32
    %c0_i32_0 = arith.constant 0 : i32
    %c0_i32_1 = arith.constant 0 : i32
    return %c0_i32, %c0_i32_0 : i32, i32
  }
  func.func @transform_3(%arg0: i32, %arg1: i32) -> (i32, i32) {
    %c0_i32 = arith.constant 0 : i32
    %c0_i32_0 = arith.constant 0 : i32
    %c0_i32_1 = arith.constant 0 : i32
    return %c0_i32, %c0_i32_0 : i32, i32
  }
  func.func @transform_4(%arg0: i32, %arg1: i32) -> (i32, i32, i32) {
    %c0_i32 = arith.constant 0 : i32
    %c0_i32_0 = arith.constant 0 : i32
    return %arg0, %c0_i32, %arg1 : i32, i32, i32
  }
}

</mosaic_0001>

<bundles_post_ra>
// kernel: gconv_forward.1
= control target key start
LH: loop header
LB: loop body
LE: loop exit
PB: predicated region body
PF: predicated region fallthrough
CT: control target
= control target key end

     0   :  { %s859_s15 = smov 0   ;;  %s861_s16 = smov 0   ;;  %s993_s0 = inlined_call_operand.vmem [shape: bf16[2,8,522], index: 0, kind: input, shape index: {}, may-alias: {0,1}]   ;;  %s994_s1 = inlined_call_operand.vmem [shape: bf16[2,8,522], index: 1, kind: input, shape index: {}, may-alias: {0,1}]   ;;  %s995_s2 = inlined_call_operand.vmem [shape: bf16[16,72], index: 2, kind: input, shape index: {}]   ;;  %s996_s3 = inlined_call_operand.vmem [shape: f32[16,1], index: 3, kind: input, shape index: {}]   ;;  %s997_s4 = inlined_call_operand.vmem [shape: f32[2,8,384], index: 4, kind: output, shape index: {}]  }
   0x1   :  { %s863_s17 = smov 0  }
   0x2 LB: > { %s26_s18 = sadd.s32 1, %s819_s16  ;;  %p725_p0 = scmp.ge.s32.totalorder %s823_s17, 1  ;;  %s823_s17 = sphi %s863_s17, %s14_s17   ;;  %s819_s16 = sphi %s861_s16, %s999_s16   ;;  %s815_s15 = sphi %s859_s15, %s998_s15  }
   0x3   : > { %p28_p1 = scmp.ge.s32.totalorder %s26_s18, 2  ;;  %p214_p2 = scmp.lt.s32.totalorder %s823_s17, 3 }
   0x5   : > { %s1001_s18 = smov (%p28_p1, %s26_s18), 0  ;;  %p215_p3 = pnand %p725_p0, %p214_p2 }
   0x6   : > { %p267_p4 = scmp.lt.s32.totalorder (!%p215_p3), %s815_s15, 1  ;;  %s825_s27 = smov (!%p215_p3), 92  }
   0x7   : > { %218 = sbr.rel (%p215_p3) target bundleno = 388 (0x184), region = 36  ;;  %s826_s28 = smov (!%p215_p3), 90  }
   0x8   : > { %s827_s29 = smov (!%p215_p3), 91   ;;  %s828_s30 = smov (!%p215_p3), 109  }
   0x9   : > { %s829_s5 = smov (!%p215_p3), 108   ;;  %s830_s6 = smov (!%p215_p3), 126  }
   0xa   : > { %s831_s7 = smov (!%p215_p3), 110   ;;  %s832_s8 = smov (!%p215_p3), 127  }
   0xc   : > { %s1003_s15 = smov (!%p267_p4, %s815_s15), 1  ;;  %vm411_vm0 = vcmask 736256   ;;  %vm415_vm1 = vcmask 1043456   ;;  %vm387_vm2 = vcmask 752640   ;;  %vm399_vm3 = vcmask 744448   ;;  %v466_v57 = vld [vmem:[%s996_s3] sm:$0xff] }
   0xd   : > { %s744_s19 = smul.u32 20, %s1003_s15  ;;  %vm375_vm4 = vcmask 883712   ;;  %vm363_vm5 = vcmask 891904   ;;  %vm339_vm6 = vcmask 1031168   ;;  %vm351_vm7 = vcmask 900096   ;;  %v467_v58 = vld [vmem:[%s996_s3 + $0x8] sm:$0xff] }
   0xe   : > { %v833_v56 = vmov 0   ;;  %vm327_vm8 = vcmask 1039360   ;;  %vm483_vm9 = vcmask 588800  }
   0xf   : > { %s742_s20 = sadd.s32 12, %s744_s19  ;;  %s274_s26 = scalar_lea.vmem %s993_s0, %s744_s19  ;;  %782 = vset.pattern.permute.xlu0 %v833_v56  ;;  %781 = vset.pattern.permute.xlu2 %v833_v56 }
  0x10   : > { %s289_s23 = scalar_lea.vmem %s994_s1, %s742_s20  ;;  %v304_v1 = vld [vmem:[%s274_s26 + $0x8] sm:$0xf]  ;;  %v303_v5 = vld [vmem:[%s274_s26] sm:$0xff]  ;;  %s746_s19 = smul.u32 24, %s1003_s15 }
  0x11   : > { %v305_v0 = vld [vmem:[%s289_s23] sm:$0xf]  ;;  %v310_v2 = vunpack.c.l.b16 %v304_v1  ;;  %v308_v7 = vunpack.c.l.b16 %v303_v5  ;;  %v309_v8 = vunpack.c.h.b16 %v303_v5 }
  0x12   : > { %385 = vrot.lane.b32.xlu1 %v305_v0, %s825_s27  ;;  %409 = vrot.lane.b32.xlu0 %v305_v0, %s826_s28  ;;  %v318_v3 = vrot.slane %v305_v0, 4  ;;  %s975_s22 = scalar_lea.vmem %s997_s4, %s746_s19 }
  0x13   : > { %v886_v4 = vpack.c.b16 %v310_v2, %v310_v2  ;;  %v891_v9 = vpack.c.b16 %v308_v7, %v308_v7  ;;  %v893_v10 = vpack.c.b16 %v309_v8, %v309_v8 }
  0x14   : > { %397 = vrot.lane.b32.xlu2 %v318_v3, %s827_s29 }
  0x15   : > { %v317_v6 = vrot.slane %v886_v4, 4  ;;  %v315_v11 = vrot.slane %v891_v9, 4  ;;  %v316_v12 = vrot.slane %v893_v10, 4 }
  0x1a   : > { %383 = vrot.lane.b32.xlu1 %v886_v4, %s825_s27  ;;  %407 = vrot.lane.b32.xlu0 %v886_v4, %s826_s28 }
  0x1c   : > { %395 = vrot.lane.b32.xlu2 %v317_v6, %s827_s29 }
  0x22   : > { %405 = vrot.lane.b32.xlu1 %v893_v10, %s826_s28  ;;  %403 = vrot.lane.b32.xlu0 %v891_v9, %s826_s28 }
  0x24   : > { %359 = vrot.lane.b32.xlu2 %v886_v4, %s828_s30 }
  0x2a   : > { %371 = vrot.lane.b32.xlu1 %v317_v6, %s829_s5  ;;  %361 = vrot.lane.b32.xlu0 %v305_v0, %s828_s30 }
  0x2c   : > { %373 = vrot.lane.b32.xlu2 %v318_v3, %s829_s5 }
  0x32   : > { %381 = vrot.lane.b32.xlu1 %v893_v10, %s825_s27  ;;  %379 = vrot.lane.b32.xlu0 %v891_v9, %s825_s27 }
  0x34   : > { %391 = vrot.lane.b32.xlu2 %v315_v11, %s827_s29 }
  0x3a   : > { %335 = vrot.lane.b32.xlu1 %v886_v4, %s830_s6  ;;  %393 = vrot.lane.b32.xlu0 %v316_v12, %s827_s29 }
  0x3c   : > { %337 = vrot.lane.b32.xlu2 %v305_v0, %s830_s6 }
  0x42   : > { %349 = vrot.lane.b32.xlu1 %v318_v3, %s831_s7  ;;  %347 = vrot.lane.b32.xlu0 %v317_v6, %s831_s7 }
  0x44   : > { %355 = vrot.lane.b32.xlu2 %v891_v9, %s828_s30 }
  0x4a   : > { %357 = vrot.lane.b32.xlu0 %v893_v10, %s828_s30  ;;  %367 = vrot.lane.b32.xlu1 %v315_v11, %s829_s5 }
  0x4c   : > { %369 = vrot.lane.b32.xlu2 %v316_v12, %s829_s5 }
  0x52   : > { %323 = vrot.lane.b32.xlu0 %v317_v6, %s832_s8  ;;  %325 = vrot.lane.b32.xlu1 %v318_v3, %s832_s8 }
  0x54   : > { %331 = vrot.lane.b32.xlu2 %v891_v9, %s830_s6 }
  0x5a   : > { %333 = vrot.lane.b32.xlu0 %v893_v10, %s830_s6  ;;  %343 = vrot.lane.b32.xlu1 %v315_v11, %s831_s7 }
  0x5c   : > { %345 = vrot.lane.b32.xlu2 %v316_v12, %s831_s7 }
  0x62   : > { %319 = vrot.lane.b32.xlu0 %v315_v11, %s832_s8  ;;  %321 = vrot.lane.b32.xlu1 %v316_v12, %s832_s8  ;;  %v743_v11 = vld [vmem:[%s995_s2] sm:$0xff] }
  0x64   : > { %475 = vperm.xlu2 %781, %v467_v58  }
  0x6a   : > { %470 = vperm.xlu0 %782, %v466_v57  }
  0x6e   : > { %v398_v13 = vpop.permute.xlu2 %397 }
  0x76   : > { %v396_v14 = vpop.permute.xlu2 %395 }
  0x77   : > { %v402_v24 = vsel %vm399_vm3, %v396_v14, %v398_v13 }
  0x7e   : > { %v907_v15 = vpop.permute.xlu2 %359 }
  0x84   : > { %v386_v16 = vpop.permute.xlu1 %385  ;;  %v410_v17 = vpop.permute.xlu0 %409 }
  0x86   : > { %v374_v20 = vpop.permute.xlu2 %373 }
  0x8c   : > { %v384_v18 = vpop.permute.xlu1 %383  ;;  %v408_v19 = vpop.permute.xlu0 %407 }
  0x8d   : > { %v414_v21 = vsel %vm411_vm0, %v408_v19, %v410_v17  ;;  %v390_v23 = vsel %vm387_vm2, %v384_v18, %v386_v16 }
  0x8e   : > { %v494_v22 = vsel %vm415_vm1, %v414_v21, 0  ;;  %v462_v25 = vsel %vm415_vm1, %v390_v23, %v402_v24  ;;  %v392_v32 = vpop.permute.xlu2 %391 }
  0x8f   : > { %527 = vmatpush.bf16.msra.mxu2 %v494_v22 }
  0x93   : > { %528 = vmatpush.bf16.msra.mxu2 %v462_v25 }
  0x94   : > { %v406_v26 = vpop.permute.xlu1 %405  ;;  %v404_v27 = vpop.permute.xlu0 %403 }
  0x95   : > { %v412_v28 = vsel %vm411_vm0, %v404_v27, %v406_v26  ;;  %v413_v29 = vsel %vm411_vm0, %v406_v26, %v408_v19 }
  0x96   : > { %v488_v30 = vsel %vm415_vm1, %v412_v28, 0  ;;  %v491_v31 = vsel %vm415_vm1, %v413_v29, 0  ;;  %v338_v38 = vpop.permute.xlu2 %337 }
  0x97   : > { %499 = vmatpush.bf16.msra.mxu0 %v488_v30  ;;  %513 = vmatpush.bf16.msra.mxu1 %v491_v31 }
  0x9c   : > { %v372_v33 = vpop.permute.xlu1 %371  ;;  %v362_v34 = vpop.permute.xlu0 %361 }
  0x9d   : > { %v378_v35 = vsel %vm375_vm4, %v372_v33, %v374_v20  ;;  %v366_v36 = vsel %vm363_vm5, %v907_v15, %v362_v34 }
  0x9e   : > { %v450_v37 = vsel %vm415_vm1, %v366_v36, %v378_v35  ;;  %v356_v41 = vpop.permute.xlu2 %355 }
  0x9f   : > { %529 = vmatpush.bf16.msra.mxu2 %v450_v37 }
  0xa4   : > { %v382_v39 = vpop.permute.xlu1 %381  ;;  %v380_v40 = vpop.permute.xlu0 %379 }
  0xa5   : > { %v389_v44 = vsel %vm387_vm2, %v382_v39, %v384_v18  ;;  %v388_v45 = vsel %vm387_vm2, %v380_v40, %v382_v39 }
  0xa6   : > { %v370_v54 = vpop.permute.xlu2 %369 }
  0xa7   : > { %v377_v61 = vsel %vm375_vm4, %v370_v54, %v372_v33 }
  0xac   : > { %v336_v42 = vpop.permute.xlu1 %335  ;;  %v394_v43 = vpop.permute.xlu0 %393 }
  0xad   : > { %v400_v46 = vsel %vm399_vm3, %v392_v32, %v394_v43  ;;  %v401_v47 = vsel %vm399_vm3, %v394_v43, %v396_v14  ;;  %v342_v52 = vsel %vm339_vm6, %v336_v42, %v338_v38 }
  0xae   : > { %v454_v48 = vsel %vm415_vm1, %v388_v45, %v400_v46  ;;  %v458_v49 = vsel %vm415_vm1, %v389_v44, %v401_v47  ;;  %v332_v3 = vpop.permute.xlu2 %331 }
  0xaf   : > { %500 = vmatpush.bf16.msra.mxu0 %v454_v48  ;;  %514 = vmatpush.bf16.msra.mxu1 %v458_v49 }
  0xb4   : > { %v350_v50 = vpop.permute.xlu1 %349  ;;  %v348_v51 = vpop.permute.xlu0 %347 }
  0xb5   : > { %v354_v53 = vsel %vm351_vm7, %v348_v51, %v350_v50 }
  0xb6   : > { %v438_v55 = vsel %vm415_vm1, %v342_v52, %v354_v53  ;;  %v346_v12 = vpop.permute.xlu2 %345 }
  0xb7   : > { %530 = vmatpush.bf16.msra.mxu2 %v438_v55 }
  0xbc   : > { %v358_v59 = vpop.permute.xlu0 %357  ;;  %v368_v60 = vpop.permute.xlu1 %367 }
  0xbd   : > { %v364_v62 = vsel %vm363_vm5, %v356_v41, %v358_v59  ;;  %v365_v63 = vsel %vm363_vm5, %v358_v59, %v907_v15  ;;  %v376_v0 = vsel %vm375_vm4, %v368_v60, %v370_v54  ;;  %v353_v15 = vsel %vm351_vm7, %v346_v12, %v348_v51 }
  0xbe   : > { %v442_v1 = vsel %vm415_vm1, %v364_v62, %v376_v0  ;;  %v446_v2 = vsel %vm415_vm1, %v365_v63, %v377_v61  ;;  %v476_v27 = vpop.permute.xlu2 %475 }
  0xbf   : > { %501 = vmatpush.bf16.msra.mxu0 %v442_v1  ;;  %515 = vmatpush.bf16.msra.mxu1 %v446_v2 }
  0xc4   : > { %v324_v5 = vpop.permute.xlu0 %323  ;;  %v326_v6 = vpop.permute.xlu1 %325 }
  0xc5   : > { %v330_v7 = vsel %vm327_vm8, %v324_v5, %v326_v6 }
  0xc6   : > { %v426_v8 = vsel %vm415_vm1, %v886_v4, %v330_v7 }
  0xc7   : > { %531 = vmatpush.bf16.msra.mxu2 %v426_v8 }
  0xca   : > { %735 = vmatmul.msk.bf16.vlgmr.msra.gmra.mxu2 %vm483_vm9, %v743_v11 }
  0xcc   : > { %v334_v13 = vpop.permute.xlu0 %333  ;;  %v344_v14 = vpop.permute.xlu1 %343 }
  0xcd   : > { %v340_v16 = vsel %vm339_vm6, %v332_v3, %v334_v13  ;;  %v341_v17 = vsel %vm339_vm6, %v334_v13, %v336_v42  ;;  %v352_v18 = vsel %vm351_vm7, %v344_v14, %v346_v12 }
  0xce   : > { %v430_v4 = vsel %vm415_vm1, %v340_v16, %v352_v18  ;;  %v434_v19 = vsel %vm415_vm1, %v341_v17, %v353_v15 }
  0xcf   : > { %502 = vmatpush.bf16.msra.mxu0 %v430_v4  ;;  %516 = vmatpush.bf16.msra.mxu1 %v434_v19 }
  0xd4   : > { %v320_v20 = vpop.permute.xlu0 %319  ;;  %v322_v21 = vpop.permute.xlu1 %321 }
  0xd5   : > { %v328_v22 = vsel %vm327_vm8, %v320_v20, %v322_v21  ;;  %v329_v23 = vsel %vm327_vm8, %v322_v21, %v324_v5 }
  0xd6   : > { %v418_v24 = vsel %vm415_vm1, %v891_v9, %v328_v22  ;;  %v422_v25 = vsel %vm415_vm1, %v893_v10, %v329_v23 }
  0xd7   : > { %503 = vmatpush.bf16.msra.mxu0 %v418_v24  ;;  %517 = vmatpush.bf16.msra.mxu1 %v422_v25 }
  0xda   : > { %733 = vmatmul.msk.bf16.vlgmr.msra.gmra.mxu0 %vm483_vm9, %v743_v11  ;;  %734 = vmatmul.msk.bf16.vlgmr.msra.gmra.mxu1 %vm483_vm9, %v743_v11 }
  0xdc   : > { %v471_v34 = vpop.permute.xlu0 %470 }
 0x14d   : > { %v533_v26 = vpop.f32.mrf.mxu2 }
 0x14e   : > { %v534_v36 = vadd.f32 %v533_v26, %v471_v34 }
 0x150   : > { %v545_v42 = vmul.f32 1.442695, %v534_v36  ;;  %vm540_vm11 = vcmp.gt.f32.partialorder %v534_v36, 0.0 }
 0x155   : > { %v535_v28 = vpop.f32.mrf.mxu2 }
 0x156   : > { %v536_v29 = vadd.f32 %v535_v28, %v476_v27 }
 0x157   : > { %v505_v30 = vpop.f32.mrf.mxu0  ;;  %v519_v31 = vpop.f32.mrf.mxu1 }
 0x158   : > { %v555_v32 = vsub.f32 0.0, %v536_v29  ;;  %v965_v45 = vadd.f32 %v505_v30, %v471_v34  ;;  %v967_v47 = vadd.f32 %v519_v31, %v471_v34 }
 0x15a   : > { %v560_v33 = vmul.f32 1.442695, %v555_v32  ;;  %v541_v54 = vmul.f32 1.442695, %v965_v45  ;;  %v543_v57 = vmul.f32 1.442695, %v967_v47 }
 0x15b   : > { %vm538_vm2 = vcmp.gt.f32.partialorder %v965_v45, 0.0  ;;  %vm539_vm5 = vcmp.gt.f32.partialorder %v967_v47, 0.0 }
 0x15c   : > { %783 = vpow2.f32 %v560_v33 }
 0x15f   : > { %v507_v9 = vpop.f32.mrf.mxu0  ;;  %v521_v35 = vpop.f32.mrf.mxu1 }
 0x160   : > { %v508_v10 = vadd.f32 %v507_v9, %v476_v27  ;;  %v522_v37 = vadd.f32 %v521_v35, %v476_v27 }
 0x162   : > { %v784_v38 = vpop.eup %783  ;;  %v553_v39 = vsub.f32 0.0, %v508_v10  ;;  %v554_v40 = vsub.f32 0.0, %v522_v37 }
 0x163   : > { %v564_v41 = vadd.f32 1.0, %v784_v38 }
 0x164   : > { %v556_v43 = vmul.f32 1.442695, %v553_v39  ;;  %v558_v44 = vmul.f32 1.442695, %v554_v40 }
 0x165   : > { %785 = vrcp.f32 %v564_v41  ;;  %v606_v56 = vand.u32 2147483648, %v564_v41  ;;  %v604_v59 = vand.u32 2147483647, %v564_v41  ;;  %vm600_vm12 = vweird.f32 %v564_v41 }
 0x166   : > { %787 = vpow2.f32 %v556_v43 }
 0x167   : > { %789 = vpow2.f32 %v558_v44  ;;  %v607_v62 = vor.u32 1.1754944e-38, %v606_v56  ;;  %vm605_vm14 = vcmp.eq.f32.partialorder %v604_v59, 8.507059e+37 }
 0x168   : > { %791 = vpow2.f32 %v545_v42 }
 0x16b   : > { %v786_v46 = vpop.eup %785 }
 0x16c   : > { %v788_v48 = vpop.eup %787  ;;  %v596_v49 = vmul.f32 %v786_v46, %v564_v41  ;;  %vm601_vm10 = vweird.f32 %v786_v46 }
 0x16d   : > { %v790_v50 = vpop.eup %789  ;;  %v562_v51 = vadd.f32 1.0, %v788_v48  ;;  %vm602_vm13 = vmor %vm600_vm12, %vm601_vm10 }
 0x16e   : > { %v792_v52 = vpop.eup %791  ;;  %v597_v53 = vsub.f32 1.0, %v596_v49  ;;  %v563_v55 = vadd.f32 1.0, %v790_v50 }
 0x16f   : > { %793 = vrcp.f32 %v562_v51  ;;  %v738_v60 = vadd.f32 -1.0, %v792_v52  ;;  %v576_v13 = vand.u32 2147483648, %v562_v51  ;;  %v574_v16 = vand.u32 2147483647, %v562_v51 }
 0x170   : > { %v598_v58 = vmul.f32 %v786_v46, %v597_v53  ;;  %795 = vrcp.f32 %v563_v55  ;;  %v591_v17 = vand.u32 2147483648, %v563_v55  ;;  %v589_v19 = vand.u32 2147483647, %v563_v55 }
 0x171   : > { %797 = vpow2.f32 %v541_v54  ;;  %v552_v1 = vsel %vm540_vm11, %v534_v36, %v738_v60  ;;  %vm570_vm1 = vweird.f32 %v562_v51  ;;  %v577_v22 = vor.u32 1.1754944e-38, %v576_v13 }
 0x172   : > { %v599_v61 = vadd.f32 %v786_v46, %v598_v58  ;;  %799 = vpow2.f32 %v543_v57  ;;  %vm585_vm4 = vweird.f32 %v563_v55  ;;  %vm575_vm6 = vcmp.eq.f32.partialorder %v574_v16, 8.507059e+37 }
 0x173   : > { %v592_v25 = vor.u32 1.1754944e-38, %v591_v17  ;;  %vm590_vm8 = vcmp.eq.f32.partialorder %v589_v19, 8.507059e+37 }
 0x174   : > { %v603_v63 = vsel %vm602_vm13, %v786_v46, %v599_v61 }
 0x175   : > { %v794_v0 = vpop.eup %793  ;;  %v608_v2 = vsel %vm605_vm14, %v607_v62, %v603_v63 }
 0x176   : > { %v796_v3 = vpop.eup %795  ;;  %v612_v5 = vmul.f32 %v608_v2, %v552_v1  ;;  %v566_v6 = vmul.f32 %v794_v0, %v562_v51  ;;  %vm571_vm15 = vweird.f32 %v794_v0 }
 0x177   : > { %v581_v7 = vmul.f32 %v796_v3, %v563_v55  ;;  %v798_v8 = vpop.eup %797  ;;  %vm586_vm0 = vweird.f32 %v796_v3  ;;  %vm572_vm3 = vmor %vm570_vm1, %vm571_vm15 }
 0x178   : > { %615 = vst [vmem:[%s975_s22 + $0x10] sm:$0xff] %v612_v5  ;;  %v567_v11 = vsub.f32 1.0, %v566_v6  ;;  %v800_v12 = vpop.eup %799  ;;  %v736_v18 = vadd.f32 -1.0, %v798_v8  ;;  %vm587_vm7 = vmor %vm585_vm4, %vm586_vm0 }
 0x179   : > { %v582_v14 = vsub.f32 1.0, %v581_v7  ;;  %v737_v20 = vadd.f32 -1.0, %v800_v12 }
 0x17a   : > { %v568_v15 = vmul.f32 %v794_v0, %v567_v11  ;;  %v550_v26 = vsel %vm538_vm2, %v965_v45, %v736_v18 }
 0x17b   : > { %v583_v4 = vmul.f32 %v796_v3, %v582_v14  ;;  %v551_v29 = vsel %vm539_vm5, %v967_v47, %v737_v20 }
 0x17c   : > { %v569_v21 = vadd.f32 %v794_v0, %v568_v15 }
 0x17d   : > { %v584_v23 = vadd.f32 %v796_v3, %v583_v4 }
 0x17e   : > { %v573_v24 = vsel %vm572_vm3, %v794_v0, %v569_v21 }
 0x17f   : > { %v578_v27 = vsel %vm575_vm6, %v577_v22, %v573_v24  ;;  %v588_v28 = vsel %vm587_vm7, %v796_v3, %v584_v23 }
 0x180   : > { %v610_v30 = vmul.f32 %v578_v27, %v550_v26  ;;  %v593_v31 = vsel %vm590_vm8, %v592_v25, %v588_v28 }
 0x181   : > { %v611_v32 = vmul.f32 %v593_v31, %v551_v29 }
 0x182   : > { %613 = vst [vmem:[%s975_s22] sm:$0xff] %v610_v30 }
 0x183   : > { %614 = vst [vmem:[%s975_s22 + $0x8] sm:$0xff] %v611_v32 }
 0x184 PF: > { %s14_s17 = sadd.s32 1, %s823_s17   ;;  %s998_s15 = smov %s819_s16 }
 0x185   : > { %p11_p5 = scmp.ge.s32.totalorder %s14_s17, 4   ;;  %s999_s16 = smov %s1001_s18 }
 0x187   :  { %13 = sbr.rel (!%p11_p5) target bundleno = 2 (0x2), region = 69 }

</bundles_post_ra>
